<compile_context>
chip_gen: v7x
topology: tpu7x:2x2x1
jax: 0.10.0
libtpu: 0.0.40
codegen_flags: <defaults>
</compile_context>

<pallas_src>
import math
import jax
import jax.numpy as jnp
from jax import lax
from jax.experimental import pallas as pl
from jax.experimental.pallas import tpu as pltpu

EPS = 1e-6
LANE = 128


def _final_layer_kernel(x_ref, w_ref, csum_ref, b_ref, o_ref):
    # x_ref: (tm, H) rows; w_ref: (H, Cp) model dtype; csum_ref/b_ref: (1, Cp) f32; o_ref: (tm, Cp)
    x = x_ref[...]
    xf = x.astype(jnp.float32)
    h = xf.shape[-1]
    inv_h = 1.0 / h

    # Single-pass LayerNorm statistics in f32 (biased variance, like torch.nn.LayerNorm).
    s = jnp.sum(xf, axis=-1, keepdims=True)
    ss = jnp.sum(xf * xf, axis=-1, keepdims=True)
    mean = s * inv_h
    var = jnp.maximum(ss * inv_h - mean * mean, 0.0)   # clamp: cancellation / garbage tail rows
    rstd = lax.rsqrt(var + EPS)

    # MXU matmul on the raw rows in the weight's native dtype, f32 accumulation.  The LN shift
    # and scale are applied afterwards on the much smaller (tm, Cp) tile:
    #   ((x - mean) * rstd) @ W + b  ==  rstd * (x @ W - mean * colsum(W)) + b
    xw = jnp.dot(x.astype(w_ref.dtype), w_ref[...], preferred_element_type=jnp.float32)
    y = (xw - mean * csum_ref[...]) * rstd + b_ref[...]
    o_ref[...] = y.astype(o_ref.dtype)


def pack_final_layer_params(weight, bias):
    """One-time packing of torch-style params (do at model load time, not per call).

    weight: (C, H), bias: (C,)  ->  (w_hc, csum_row, b_row) where
      w_hc:     (H, C_pad) in the weight's dtype, zero padded to a multiple of 128 lanes
      csum_row: (1, C_pad) float32 column sums of w_hc (for folding the LN mean)
      b_row:    (1, C_pad) float32
    """
    C, H = weight.shape
    Cp = pl.cdiv(C, LANE) * LANE
    w_hc = weight.T                                        # (H, C)
    csum = jnp.sum(weight.astype(jnp.float32), axis=1)     # (C,)  = sum over H of w_hc
    b = bias.astype(jnp.float32)
    if Cp != C:
        w_hc = jnp.pad(w_hc, ((0, 0), (0, Cp - C)))
        csum = jnp.pad(csum, (0, Cp - C))
        b = jnp.pad(b, (0, Cp - C))
    return w_hc, csum.reshape(1, Cp), b.reshape(1, Cp)


def _tpu_generation():
    try:
        kind = jax.devices()[0].device_kind.lower()
    except Exception:
        return 0
    for g in (7, 6, 5, 4):
        if f"v{g}" in kind:
            return g
    return 0


def _pick_tile(rows, H, Cp, x_item, w_item, sub, requested, gen):
    # Generation-aware default row tile (amortize ~0.35us per-step overhead).
    tm = requested if requested is not None else (2048 if gen >= 7 else 1024)
    tm = max(sub, (tm // sub) * sub)

    # Clamp to the (sublane-rounded) row count so tiny inputs still work.
    rows_sub = pl.cdiv(rows, sub) * sub
    tm = min(tm, rows_sub)

    # Cap so the per-step working set (double-buffered tiles + resident weight + f32 temps)
    # fits comfortably in the generation's VMEM budget.
    cap = (48 if gen >= 7 else 100) * 1024 * 1024
    bytes_w = H * Cp * w_item + 2 * Cp * 4
    per_row = 2 * H * x_item + 2 * Cp * x_item + 2 * H * 4 + 2 * Cp * 4
    tm_cap = max(sub, int((0.8 * cap - bytes_w) // max(per_row, 1)))
    tm = max(sub, min(tm, (tm_cap // sub) * sub))

    # Keep at least 2 grid steps when there is more than one sublane's worth of rows, so
    # dimension_semantics=("parallel",) can use both v7x TensorCores and the pipeline has >1 step.
    if pl.cdiv(rows, tm) < 2 and rows > sub:
        tm = max(sub, pl.cdiv(pl.cdiv(rows, 2), sub) * sub)
    return tm, cap


def final_layer(x, w_hc, csum_row, b_row, out_channels, *, tm=None):
    """x: (B, T, H); packed params from pack_final_layer_params. Returns (B, T, out_channels)."""
    B, T, H = x.shape
    Cp = w_hc.shape[1]
    rows = B * T
    x2 = x.reshape(rows, H)

    gen = _tpu_generation()
    sub = 16 if x.dtype == jnp.bfloat16 else 8
    tm, cap = _pick_tile(rows, H, Cp, x2.dtype.itemsize, w_hc.dtype.itemsize, sub, tm, gen)

    grid = (pl.cdiv(rows, tm),)   # no row padding: last block may be partial (masked writes)

    # VMEM budget: double-buffered x/out tiles + resident weight/csum/bias + f32 temporaries
    # (x upcast, x*x, f32 matmul result) + 25% headroom; capped per generation.
    x_item = x2.dtype.itemsize
    bytes_in = 2 * tm * H * x_item
    bytes_out = 2 * tm * Cp * x_item
    bytes_w = H * Cp * w_hc.dtype.itemsize + 2 * Cp * 4
    bytes_tmp = 2 * tm * H * 4 + 2 * tm * Cp * 4
    vmem_limit = int(min(cap, max(4 * 1024 * 1024,
                                  int(1.25 * (bytes_in + bytes_out + bytes_w + bytes_tmp)))))

    out = pl.pallas_call(
        _final_layer_kernel,
        out_shape=jax.ShapeDtypeStruct((rows, Cp), x.dtype),
        grid_spec=pltpu.PrefetchScalarGridSpec(
            num_scalar_prefetch=0,
            grid=grid,
            in_specs=[
                pl.BlockSpec((tm, H), lambda i: (i, 0)),    # row tile of x
                pl.BlockSpec((H, Cp), lambda i: (0, 0)),    # full (padded) weight, resident
                pl.BlockSpec((1, Cp), lambda i: (0, 0)),    # column sums (f32)
                pl.BlockSpec((1, Cp), lambda i: (0, 0)),    # bias row (f32)
            ],
            out_specs=pl.BlockSpec((tm, Cp), lambda i: (i, 0)),  # lane-dense output
        ),
        compiler_params=pltpu.CompilerParams(
            dimension_semantics=("parallel",),
            vmem_limit_bytes=vmem_limit),
    )(x2, w_hc, csum_row, b_row)

    # Identity when out_channels is already a multiple of 128; otherwise prefer fusing this
    # slice/reshape into the consumer (unpatchify) to avoid an extra HBM round trip.
    return out[:, :out_channels].reshape(B, T, out_channels)


def _reference(x, weight, bias):
    xf = x.astype(jnp.float32)
    mean = jnp.mean(xf, axis=-1, keepdims=True)
    var = jnp.mean((xf - mean) ** 2, axis=-1, keepdims=True)
    xn = (xf - mean) * lax.rsqrt(var + EPS)
    return (xn @ weight.T.astype(jnp.float32) + bias.astype(jnp.float32)).astype(x.dtype)


if __name__ == "__main__":
    # Small shapes consistent with the module: batch=2, seq=8, hidden=32, out_channels=16
    B, T, H, C = 2, 8, 32, 16

    key = jax.random.PRNGKey(0)
    kx, kw, kb = jax.random.split(key, 3)

    x = jax.random.normal(kx, (B, T, H), dtype=jnp.float32)

    # Deterministic nn.Linear-style init: U(-1/sqrt(H), 1/sqrt(H))
    bound = 1.0 / math.sqrt(H)
    weight = jax.random.uniform(kw, (C, H), minval=-bound, maxval=bound, dtype=jnp.float32)
    bias = jax.random.uniform(kb, (C,), minval=-bound, maxval=bound, dtype=jnp.float32)

    # One-time parameter packing (transpose + lane padding + column sums), outside the per-call path.
    w_hc, csum_row, b_row = pack_final_layer_params(weight, bias)

    out = final_layer(x, w_hc, csum_row, b_row, C)
    out = jax.block_until_ready(out)

    ref = _reference(x, weight, bias)
    assert out.shape == (B, T, C)
    assert jnp.allclose(out, ref, atol=2e-5, rtol=2e-5), "mismatch vs reference"

    print("KERNEL_OK")
</pallas_src>

<mosaic_0001>
module attributes {stable_mosaic.version = 11 : i64} {
  func.func @_final_layer_kernel(%arg0: i32, %arg1: memref<8x32xf32, #tpu.memory_space<vmem>>, %arg2: memref<32x128xf32, #tpu.memory_space<vmem>>, %arg3: memref<1x128xf32, #tpu.memory_space<vmem>>, %arg4: memref<1x128xf32, #tpu.memory_space<vmem>>, %arg5: memref<8x128xf32, #tpu.memory_space<vmem>>) attributes {dimension_semantics = [#tpu.dimension_semantics<parallel>], iteration_bounds = array<i64: 2>, scalar_prefetch = 0 : i64, scratch_operands = 0 : i64, tpu.core_type = #tpu.core_type<tc>, window_params = [{transform_indices = @transform_0, window_bounds = array<i64: 8, 32>}, {pipeline_mode = #tpu.pipeline_mode<synchronous>, transform_indices = @transform_1, window_bounds = array<i64: 32, 128>}, {pipeline_mode = #tpu.pipeline_mode<synchronous>, transform_indices = @transform_2, window_bounds = array<i64: 1, 128>}, {pipeline_mode = #tpu.pipeline_mode<synchronous>, transform_indices = @transform_3, window_bounds = array<i64: 1, 128>}, {transform_indices = @transform_4, window_bounds = array<i64: 8, 128>}]} {
    %c0 = arith.constant 0 : index
    %c0_0 = arith.constant 0 : index
    %0 = vector.load %arg1[%c0, %c0_0] : memref<8x32xf32, #tpu.memory_space<vmem>>, vector<8x32xf32>
    %cst = arith.constant dense<0.000000e+00> : vector<8xf32>
    %1 = vector.multi_reduction <add>, %0, %cst [1] : vector<8x32xf32> to vector<8xf32>
    %2 = vector.shape_cast %1 : vector<8xf32> to vector<8x1xf32>
    %3 = arith.mulf %0, %0 : vector<8x32xf32>
    %cst_1 = arith.constant dense<0.000000e+00> : vector<8xf32>
    %4 = vector.multi_reduction <add>, %3, %cst_1 [1] : vector<8x32xf32> to vector<8xf32>
    %5 = vector.shape_cast %4 : vector<8xf32> to vector<8x1xf32>
    %cst_2 = arith.constant 3.125000e-02 : f32
    %6 = vector.broadcast %cst_2 : f32 to vector<8x1xf32>
    %7 = arith.mulf %2, %6 : vector<8x1xf32>
    %cst_3 = arith.constant 3.125000e-02 : f32
    %8 = vector.broadcast %cst_3 : f32 to vector<8x1xf32>
    %9 = arith.mulf %5, %8 : vector<8x1xf32>
    %10 = arith.mulf %7, %7 : vector<8x1xf32>
    %11 = arith.subf %9, %10 : vector<8x1xf32>
    %cst_4 = arith.constant 0.000000e+00 : f32
    %12 = vector.broadcast %cst_4 : f32 to vector<8x1xf32>
    %13 = arith.maximumf %11, %12 : vector<8x1xf32>
    %cst_5 = arith.constant 9.99999997E-7 : f32
    %14 = vector.broadcast %cst_5 : f32 to vector<8x1xf32>
    %15 = arith.addf %13, %14 : vector<8x1xf32>
    %16 = math.rsqrt %15 : vector<8x1xf32>
    %c0_6 = arith.constant 0 : index
    %c0_7 = arith.constant 0 : index
    %17 = vector.load %arg2[%c0_6, %c0_7] : memref<32x128xf32, #tpu.memory_space<vmem>>, vector<32x128xf32>
    %cst_8 = arith.constant dense<0.000000e+00> : vector<8x128xf32>
    %18 = tpu.matmul %0, %17, %cst_8 {dimension_numbers = #tpu.dot_dimension_numbers<[1], [0], [0], [1], [0, 0, 1, 1], [], []>} : vector<8x32xf32>, vector<32x128xf32>, vector<8x128xf32> -> vector<8x128xf32>
    %c0_9 = arith.constant 0 : index
    %c0_10 = arith.constant 0 : index
    %19 = vector.load %arg3[%c0_9, %c0_10] : memref<1x128xf32, #tpu.memory_space<vmem>>, vector<1x128xf32>
    %20 = vector.broadcast %7 : vector<8x1xf32> to vector<8x128xf32>
    %21 = vector.broadcast %19 : vector<1x128xf32> to vector<8x128xf32>
    %22 = arith.mulf %20, %21 : vector<8x128xf32>
    %23 = arith.subf %18, %22 : vector<8x128xf32>
    %24 = vector.broadcast %16 : vector<8x1xf32> to vector<8x128xf32>
    %25 = arith.mulf %23, %24 : vector<8x128xf32>
    %c0_11 = arith.constant 0 : index
    %c0_12 = arith.constant 0 : index
    %26 = vector.load %arg4[%c0_11, %c0_12] : memref<1x128xf32, #tpu.memory_space<vmem>>, vector<1x128xf32>
    %27 = vector.broadcast %26 : vector<1x128xf32> to vector<8x128xf32>
    %28 = arith.addf %25, %27 : vector<8x128xf32>
    %c0_13 = arith.constant 0 : index
    %c0_14 = arith.constant 0 : index
    %29 = vector.load %arg5[%c0_13, %c0_14] : memref<8x128xf32, #tpu.memory_space<vmem>>, vector<8x128xf32>
    tpu.vector_store %arg5[%c0_13, %c0_14], %28 {strides = array<i32>} : memref<8x128xf32, #tpu.memory_space<vmem>>, vector<8x128xf32>,
    return
  }
  func.func @transform_0(%arg0: i32) -> (i32, i32) {
    %c0_i32 = arith.constant 0 : i32
    %c0_i32_0 = arith.constant 0 : i32
    return %arg0, %c0_i32 : i32, i32
  }
  func.func @transform_1(%arg0: i32) -> (i32, i32) {
    %c0_i32 = arith.constant 0 : i32
    %c0_i32_0 = arith.constant 0 : i32
    %c0_i32_1 = arith.constant 0 : i32
    return %c0_i32, %c0_i32_0 : i32, i32
  }
  func.func @transform_2(%arg0: i32) -> (i32, i32) {
    %c0_i32 = arith.constant 0 : i32
    %c0_i32_0 = arith.constant 0 : i32
    %c0_i32_1 = arith.constant 0 : i32
    return %c0_i32, %c0_i32_0 : i32, i32
  }
  func.func @transform_3(%arg0: i32) -> (i32, i32) {
    %c0_i32 = arith.constant 0 : i32
    %c0_i32_0 = arith.constant 0 : i32
    %c0_i32_1 = arith.constant 0 : i32
    return %c0_i32, %c0_i32_0 : i32, i32
  }
  func.func @transform_4(%arg0: i32) -> (i32, i32) {
    %c0_i32 = arith.constant 0 : i32
    %c0_i32_0 = arith.constant 0 : i32
    return %arg0, %c0_i32 : i32, i32
  }
}

</mosaic_0001>

<bundles_post_ra>
// kernel: tpu_custom_call.1
= control target key start
LH: loop header
LB: loop body
LE: loop exit
PB: predicated region body
PF: predicated region fallthrough
CT: control target
= control target key end

     0   :  { %9 = vsyncpa [#allocation3], 0  ;;  %s906_s0 = inlined_call_operand.hbm [shape: f32[16,32], index: 0, kind: input, shape index: {}]   ;;  %s907_s1 = inlined_call_operand.hbm [shape: f32[32,128], index: 1, kind: input, shape index: {}]   ;;  %s908_s2 = inlined_call_operand.vmem [shape: f32[1,128], index: 2, kind: input, shape index: {}]   ;;  %s909_s3 = inlined_call_operand.vmem [shape: f32[1,128], index: 3, kind: input, shape index: {}]   ;;  %s910_s4 = inlined_call_operand.hbm [shape: f32[16,128], index: 4, kind: output, shape index: {}]  }
   0x1   :  { %11 = vsyncpa [#allocation3 + $0x1], 0 }
   0x2   :  { %12 = vsyncpa [#allocation6], 0 }
   0x3   :  { %13 = vsyncpa [#allocation4], 0 }
   0x4   :  { %15 = vsyncpa [#allocation4 + $0x1], 0  ;;  %s700_s15 = smov 0   ;;  %s702_s16 = smov 0  }
   0x5   :  { %s704_s17 = smov 0   ;;  %s706_s18 = smov 0  }
   0x6 LB: > { %s721_s19 = sadd.s32 4294967295, %s665_s18   ;;  %s434_s20 = sadd.s32 4294967294, %s665_s18   ;;  %s665_s18 = sphi %s706_s18, %s930_s18   ;;  %s661_s17 = sphi %s704_s17, %s929_s17   ;;  %s657_s16 = sphi %s702_s16, %s928_s16   ;;  %s653_s15 = sphi %s700_s15, %s927_s15  }
   0x7   : > { %p41_p0 = scmp.ne.s32.totalorder %s657_s16, %s653_s15  ;;  %p911_p1 = scmp.eq.s32.totalorder %s721_s19, 0 }
   0x8   : > { %p134_p3 = scmp.eq.s32.totalorder %s434_s20, 1  ;;  %p435_p5 = scmp.ge.s32.totalorder %s665_s18, 1 }
   0x9   : > { %p730_p4 = por %p911_p1, %p41_p0  ;;  %p141_p7 = scmp.lt.s32.totalorder %s665_s18, 3 }
   0xa   : > { %p735_p6 = por %p134_p3, %p41_p0  ;;  %s667_s24 = smov [#allocation5]  }
   0xb   : > { %s914_s21 = scalar_select %p730_p4, 1, 0 }
   0xc   : > { %s915_s22 = scalar_select %p735_p6, 1, 0 }
   0xd   : > { %p740_p8 = pnand %p435_p5, %p141_p7  ;;  %s153_s25 = sshll.u32 %s667_s24, 4  ;;  %s744_s25 = int_to_ptr.vmem [resolvable:$true] %s153_s25 }
   0xe   : > { %s756_s27 = sadd.s32 1, %s665_s18   ;;  %s28_s28 = sadd.s32 1, %s661_s17 }
   0xf   : > { %s916_s23 = scalar_select %p740_p8, 1, 0 }
  0x10   : > { %p481_p9 = pneg %p740_p8  ;;  %s25_s29 = ssub.s32 %s665_s18, %s756_s27 }
  0x11   : > { %s537_s6 = scalar_lea.hbm %s907_s1, 512 }
  0x12   : > { %p751_p11 = pnand %p481_p9, %p911_p1  ;;  %p538_p12 = scmp.ne.s32.totalorder %s907_s1, %s537_s6 }
  0x13   : > { %p544_p5 = scmp.lt.u32.totalorder %s537_s6, %s907_s1 }
  0x14   : > { %p539_p13 = pneg %p751_p11 }
  0x16   : > { %p540_p0 = pnand %p539_p13, %p538_p12 }
  0x18   : > { %p541_p3 = pneg %p540_p0 }
  0x1a   : > { %p546_p7 = pnand %p544_p5, %p541_p3 }
  0x1c   : > { %549 = shalt.err (!%p546_p7)
}
  0x1d   : > { %s550_s11 = scalar_lea.vmem %s744_s25, 512  ;;  %p558_p2 = scmp.lt.s32.totalorder %s744_s25, %s744_s25 }
  0x1e   : > { %p551_p9 = scmp.ne.s32.totalorder %s744_s25, %s550_s11  ;;  %p559_p6 = scmp.lt.s32.totalorder %s550_s11, %s550_s11 }
  0x20   : > { %p553_p10 = pnand %p551_p9, %p539_p13  ;;  %p560_p4 = por %p559_p6, %p558_p2 }
  0x22   : > { %p554_p1 = pneg %p553_p10 }
  0x24   : > { %p561_p8 = pnand %p560_p4, %p554_p1 }
  0x26   : > { %564 = shalt.err (!%p561_p8)
}
  0x27   : > { %s668_s12 = smov 128   ;;  %s669_s13 = smov 8  }
  0x28   : > { %484 = dma.hbm_to_vmem [thread:$0]  (!%p751_p11), %s907_s1, 512, %s744_s25, [#allocation6], %s668_s12, %s668_s12, %s669_s13  }
  0x29   : > { %p26_p2 = scmp.eq.s32.totalorder %s25_s29, 0  ;;  %p35_p1 = scmp.ne.s32.totalorder %s661_s17, %s657_s16 }
  0x2a   : > { %p36_p4 = scmp.eq.s32.totalorder %s665_s18, 0  ;;  %p494_p6 = scmp.lt.s32.totalorder %s665_s18, 2 }
  0x2b   : > { %s787_s24 = scalar_select %p26_p2, %s661_s17, %s28_s28  }
  0x2c   : > { %p37_p8 = por %p36_p4, %p35_p1  ;;  %p918_p10 = scmp.eq.s32.totalorder %s721_s19, 1 }
  0x2d   : > { %s173_s5 = sand.u32 1, %s661_s17   ;;  %s439_s6 = sshll.u32 %s665_s18, 7 }
  0x2e   : > { %p791_p12 = por %p918_p10, %p35_p1  ;;  %s438_s7 = sshll.u32 %s173_s5, 3 }
  0x2f   : > { %s800_s9 = scalar_lea.hbm %s906_s0, %s439_s6  ;;  %s177_s25 = scalar_lea.vmem [#allocation2], %s438_s7 }
  0x30   : > { %s184_s28 = sshll.u32 %s177_s25, 4  ;;  %p802_p11 = pnand %p494_p6, %p37_p8  ;;  %s806_s28 = int_to_ptr.vmem [resolvable:$true] %s184_s28 }
  0x31   : > { %s174_s10 = scalar_lea.sflag [#allocation3], %s173_s5  ;;  %s565_s11 = scalar_lea.hbm %s800_s9, 128 }
  0x32   : > { %p566_p13 = scmp.ne.s32.totalorder %s800_s9, %s565_s11  ;;  %p567_p0 = pneg %p802_p11 }
  0x33   : > { %s570_s14 = scalar_lea.hbm %s906_s0, 256  ;;  %p571_p7 = scmp.lt.u32.totalorder %s800_s9, %s906_s0 }
  0x34   : > { %p568_p3 = pnand %p567_p0, %p566_p13  ;;  %p572_p9 = scmp.lt.u32.totalorder %s570_s14, %s565_s11 }
  0x35   : > { %p574_p1 = scmp.lt.u32.totalorder %s565_s11, %s800_s9 }
  0x36   : > { %p569_p5 = pneg %p568_p3  ;;  %p573_p2 = por %p572_p9, %p571_p7 }
  0x38   : > { %p575_p4 = por %p574_p1, %p573_p2 }
  0x3a   : > { %p576_p6 = pnand %p575_p4, %p569_p5 }
  0x3c   : > { %579 = shalt.err (!%p576_p6)
}
  0x3d   : > { %s580_s5 = scalar_lea.vmem %s806_s28, 128  ;;  %s670_s7 = smov [#allocation2]  }
  0x3e   : > { %p581_p8 = scmp.ne.s32.totalorder %s806_s28, %s580_s5  ;;  %s585_s26 = sshll.u32 %s670_s7, 4  ;;  %s586_s26 = int_to_ptr.vmem [resolvable:$false] %s585_s26 }
  0x3f   : > { %s587_s8 = scalar_lea.vmem %s586_s26, 256  ;;  %p588_p3 = scmp.lt.s32.totalorder %s806_s28, %s586_s26 }
  0x40   : > { %p583_p10 = pnand %p581_p8, %p567_p0  ;;  %p589_p7 = scmp.lt.s32.totalorder %s587_s8, %s580_s5 }
  0x42   : > { %p584_p13 = pneg %p583_p10  ;;  %p590_p9 = por %p589_p7, %p588_p3 }
  0x44   : > { %p591_p2 = pnand %p590_p9, %p584_p13 }
  0x46   : > { %594 = shalt.err (!%p591_p2)
}
  0x47   : > { %488 = dma.hbm_to_vmem [thread:$0]  (!%p802_p11), %s800_s9, 128, %s806_s28, %s174_s10  }
  0x48   : > { %p921_p5 = scmp.ne.s32.totalorder %s916_s23, 0 }
  0x49   : > { %s836_s25 = sand.u32 (!%p921_p5), 1, %s657_s16   ;;  %p922_p0 = scmp.ne.s32.totalorder (!%p921_p5), %s914_s21, 0 }
  0x4a   : > { %193 = sbr.rel (%p921_p5) target bundleno = 327 (0x147), region = 36  ;;  %s441_s11 = sshll.u32 (!%p921_p5), %s836_s25, 3 }
  0x4b   : > { %s196_s12 = scalar_lea.sflag (!%p921_p5), [#allocation3], %s836_s25  ;;  %s199_s13 = scalar_lea.vmem (!%p921_p5), [#allocation2], %s441_s11 }
  0x51   : > { %640 = dma.done.wait (%p922_p0), %s196_s12, 128  }
  0x52   : > { %642 = vsyncadd (%p922_p0), %s196_s12, 4294967168  ;;  %p923_p11 = scmp.eq.s32.totalorder %s721_s19, 0 }
  0x54   : > { %644 = dma.done.wait (%p923_p11), [#allocation6], 512   ;;  %p924_p1 = pmov %p923_p11 }
  0x55   : > { %v671_v0 = vmov 0.0|0.0   ;;  %vm672_vm0 = vmmov 0   ;;  %v673_v1 = vmov 0.0   ;;  %v244_v2 = vld [vmem:[#allocation5] sm:$0xff]  ;;  %v245_v3 = vld [vmem:[#allocation5 + $0x8] sm:$0xff]  ;;  %v246_v4 = vld [vmem:[#allocation5 + $0x10] sm:$0xff] }
  0x56   : > { %646 = vsyncadd (%p924_p1), [#allocation6], 4294966784  ;;  %467 = vmatprep.subr.bf16.mxu0 %v671_v0  ;;  %464 = vmatprep.mubr.msk.f32.mxu0 %vm672_vm0, %v673_v1  ;;  %v468_v5 = vpack.c.bf16 %v245_v3, %v244_v2  ;;  %v247_v6 = vld [vmem:[#allocation5 + $0x18] sm:$0xff]  ;;  %vm229_vm1 = vcmask 261120   ;;  %v445_v20 = vld [vmem:[%s908_s2] ss:$0 sm:$0xff] }
  0x57   : > { %v228_v7 = vld [vmem:[%s199_s13] sm:$0xff]  ;;  %v471_v10 = vpack.c.bf16 %v247_v6, %v246_v4  ;;  %s448_s29 = sshll.u32 %s721_s19, 7  ;;  %s227_s10 = scalar_lea.vmem [#allocation7], %s441_s11 }
  0x58   : > { %v230_v8 = vsel %vm229_vm1, %v228_v7, 0.0  ;;  %v233_v9 = vmul.f32 %v228_v7, %v228_v7  ;;  %469 = vmatpush3.bf16.msra.mxu0 %v468_v5  ;;  %v446_v26 = vld [vmem:[%s909_s3] ss:$0 sm:$0xff]  ;;  %s354_s14 = sshll.u32 %s227_s10, 4  ;;  %s862_s5 = scalar_lea.hbm %s910_s4, %s448_s29  ;;  %s864_s14 = int_to_ptr.vmem [resolvable:$true] %s354_s14 }
  0x59   : > { %231 = vadd.xlane.f32.xlu0 %v230_v8  ;;  %470 = vmatprep.subr.bf16.mxu0 %v671_v0  ;;  %s341_s7 = scalar_lea.sflag [#allocation4], %s836_s25  ;;  %s595_s26 = scalar_lea.vmem %s864_s14, 128 }
  0x5a   : > { %v234_v11 = vsel %vm229_vm1, %v233_v9, 0.0  ;;  %p596_p4 = scmp.ne.s32.totalorder %s864_s14, %s595_s26  ;;  %s674_s19 = smov [#allocation7]  }
  0x5b   : > { %s599_s8 = sshll.u32 %s674_s19, 4  ;;  %s600_s8 = int_to_ptr.vmem [resolvable:$false] %s599_s8 }
  0x5c   : > { %472 = vmatpush3.bf16.msra.mxu0 %v471_v10  ;;  %p597_p6 = pnand %p596_p4, %p791_p12  ;;  %s601_s11 = scalar_lea.vmem %s600_s8, 256 }
  0x5d   : > { %235 = vadd.xlane.f32.xlu0 %v234_v11  ;;  %p602_p10 = scmp.lt.s32.totalorder %s864_s14, %s600_s8  ;;  %p603_p13 = scmp.lt.s32.totalorder %s601_s11, %s595_s26 }
  0x5e   : > { %p598_p8 = pneg %p597_p6 }
  0x5f   : > { %465 = vmatmul.mubr.msk.f32.vlgmr.msra.gmra.mrb[0].mxu0 %vm229_vm1, %v228_v7  ;;  %p604_p3 = por %p603_p13, %p602_p10 }
  0x61   : > { %p605_p7 = pnand %p604_p3, %p598_p8 }
  0xe6   : > { %v232_v12 = vpop.xlane.xlu0 %231 }
  0xe7   : > { %v237_v13 = vmul.f32 0.03125, %v232_v12 }
  0xe9   : > { %v239_v15 = vmul.f32 %v237_v13, %v237_v13  ;;  %v328_v21 = vmul.f32 %v445_v20, %v237_v13 }
  0xea   : > { %v236_v14 = vpop.xlane.xlu0 %235 }
  0xeb   : > { %v238_v16 = vmul.f32 0.03125, %v236_v14 }
  0xed   : > { %v240_v17 = vsub.f32 %v238_v16, %v239_v15 }
  0xef   : > { %v241_v18 = vmax.f32 %v240_v17, 0.0 }
  0xf1   : > { %v242_v19 = vadd.f32 1e-06, %v241_v18 }
  0xf3   : > { %535 = vrsqrt.f32 %v242_v19 }
  0xfd   : > { %v536_v25 = vpop.eup %535 }
 0x132   : > { %v317_v22 = vpop.f32.mrb[0].mxu0 }
 0x133   : > { %v329_v23 = vsub.f32 %v317_v22, %v328_v21  ;;  %v466_v24 = vpop.f32.mrb[1].mxu0 }
 0x135   : > { %v330_v27 = vmul.f32 %v536_v25, %v329_v23 }
 0x137   : > { %v338_v28 = vadd.f32 %v446_v26, %v330_v27 }
 0x139   : > { %339 = vst [vmem:[%s227_s10] sm:$0xff] %v338_v28 }
 0x13a   : > { %608 = shalt.err (!%p605_p7)
}
 0x13b   : > { %s609_s25 = scalar_lea.hbm %s862_s5, 128  ;;  %s613_s21 = scalar_lea.hbm %s910_s4, 256 }
 0x13c   : > { %p610_p9 = scmp.ne.s32.totalorder %s862_s5, %s609_s25  ;;  %p614_p0 = scmp.lt.u32.totalorder %s862_s5, %s910_s4 }
 0x13d   : > { %p615_p11 = scmp.lt.u32.totalorder %s613_s21, %s609_s25  ;;  %p617_p4 = scmp.lt.u32.totalorder %s609_s25, %s862_s5 }
 0x13e   : > { %p611_p2 = pnand %p610_p9, %p791_p12 }
 0x13f   : > { %p616_p1 = por %p615_p11, %p614_p0 }
 0x140   : > { %p612_p5 = pneg %p611_p2 }
 0x141   : > { %p618_p6 = por %p617_p4, %p616_p1 }
 0x143   : > { %p619_p8 = pnand %p618_p6, %p612_p5 }
 0x145   : > { %622 = shalt.err (!%p619_p8)
}
 0x146   : > { %479 = dma.vmem_to_hbm [thread:$0]  (%p791_p12), %s864_s14, 128, %s862_s5, %s341_s7  }
 0x147 PF: > { %s366_s28 = sand.u32 1, %s653_s15   ;;  %p925_p10 = scmp.ne.s32.totalorder %s915_s22, 0 }
 0x148   : > { %p926_p13 = scmp.ge.s32.totalorder %s665_s18, 2  ;;  %s367_s29 = scalar_lea.sflag [#allocation4], %s366_s28 }
 0x14a   : > { %p490_p3 = pnand %p926_p13, %p925_p10 }
 0x14c   : > { %648 = dma.done.wait (!%p490_p3), %s367_s29, 128  }
 0x14d   : > { %650 = vsyncadd (!%p490_p3), %s367_s29, 4294967168  ;;  %p18_p7 = scmp.ge.s32.totalorder %s756_s27, 4   ;;  %s927_s15 = smov %s657_s16 }
 0x14e   : > { %s928_s16 = smov %s661_s17  ;;  %s929_s17 = smov %s787_s24 }
 0x14f   : > { %s930_s18 = smov %s756_s27  ;;  %20 = sbr.rel (!%p18_p7) target bundleno = 6 (0x6), region = 85 }
 0x156   :  { %372 = vsyncpa [#allocation3], 1 }
 0x157   :  { %374 = vsyncpa [#allocation3 + $0x1], 1 }
 0x158   :  { %375 = vsyncpa [#allocation6], 1 }
 0x159   :  { %376 = vsyncpa [#allocation4], 1 }
 0x15a   :  { %378 = vsyncpa [#allocation4 + $0x1], 1 }

</bundles_post_ra>
